<compile_context>
chip_gen: v5e
topology: v5e:2x2
jax: 0.10.0
libtpu: 0.0.40
codegen_flags: <defaults>
</compile_context>

<pallas_src>
import functools

import jax
import jax.numpy as jnp
from jax import lax
from jax.experimental import pallas as pl
from jax.experimental.pallas import tpu as pltpu


def _round_up(x: int, m: int) -> int:
    return ((x + m - 1) // m) * m


def _sublane_multiple(dtype) -> int:
    # Rows per packed sublane group: f32 -> 8, bf16 -> 16, int8/fp8 -> 32.
    return max(8, 32 // jnp.dtype(dtype).itemsize)


def _vmem_budget_bytes() -> int:
    """Usable VMEM budget: physical capacity minus headroom (per generation)."""
    cap = 64 * 1024 * 1024  # conservative fallback = v7x physical VMEM
    try:
        info = pltpu.get_tpu_info()
        cap = int(getattr(info, "vmem_capacity_bytes", cap) or cap)
    except Exception:
        pass
    return int(cap * 0.70)


# ----------------------------------------------------------------------------
# Kernels
# ----------------------------------------------------------------------------

def _layernorm_leaky_relu(y, gamma, beta, *, out_dim, n_pad, eps, neg_slope):
    """LayerNorm over the TRUE out_dim, then LeakyReLU.

    y is (tm, n_pad) f32 whose padded columns (>= out_dim) are exactly zero
    (W / bias pads are zero), so the mean only needs 1/out_dim scaling. The
    variance is two-pass (centered) for precision, with pad columns masked out.
    """
    inv_n = jnp.float32(1.0 / out_dim)
    mean = jnp.sum(y, axis=-1, keepdims=True) * inv_n
    centered = y - mean
    if n_pad != out_dim:
        col = lax.broadcasted_iota(jnp.int32, y.shape, 1)
        centered = jnp.where(col < out_dim, centered, 0.0)
    var = jnp.sum(centered * centered, axis=-1, keepdims=True) * inv_n
    y_hat = centered * lax.rsqrt(var + jnp.float32(eps))
    y_ln = y_hat * gamma + beta
    return jnp.where(y_ln >= 0, y_ln, jnp.float32(neg_slope) * y_ln)


def _fc_kernel_resident(x_ref, w_ref, b_ref, g_ref, beta_ref, o_ref, *,
                        out_dim, n_pad, eps, neg_slope):
    """Path A: W resident in VMEM — single K step, no accumulator scratch."""
    y = jnp.dot(x_ref[...], w_ref[...], preferred_element_type=jnp.float32)
    y = y + b_ref[...].astype(jnp.float32)
    out = _layernorm_leaky_relu(y,
                                g_ref[...].astype(jnp.float32),
                                beta_ref[...].astype(jnp.float32),
                                out_dim=out_dim, n_pad=n_pad,
                                eps=eps, neg_slope=neg_slope)
    o_ref[...] = out.astype(o_ref.dtype)


def _fc_kernel_ktiled(x_ref, w_ref, b_ref, g_ref, beta_ref, o_ref, acc_ref, *,
                      out_dim, n_pad, eps, neg_slope):
    """Path B: K-tiled matmul with f32 accumulator; bias fused into k==0 store."""
    k = pl.program_id(1)
    partial = jnp.dot(x_ref[...], w_ref[...], preferred_element_type=jnp.float32)

    @pl.when(k == 0)
    def _():
        acc_ref[...] = partial + b_ref[...].astype(jnp.float32)

    @pl.when(k > 0)
    def _():
        acc_ref[...] += partial

    @pl.when(k == pl.num_programs(1) - 1)
    def _():
        out = _layernorm_leaky_relu(acc_ref[...],
                                    g_ref[...].astype(jnp.float32),
                                    beta_ref[...].astype(jnp.float32),
                                    out_dim=out_dim, n_pad=n_pad,
                                    eps=eps, neg_slope=neg_slope)
        o_ref[...] = out.astype(o_ref.dtype)


# ----------------------------------------------------------------------------
# Wrapper
# ----------------------------------------------------------------------------

def prepare_fc_params(w, b, gamma, beta, compute_dtype=None):
    """Pre-transpose / pre-pad the static layer parameters ONCE.

    w: (out_dim, in_dim) PyTorch nn.Linear layout; b/gamma/beta: (out_dim,).
    compute_dtype: optionally cast W (and x inside fc_layer) to e.g. bf16 for the
    matmul while keeping the f32 accumulator + LN epilogue.
    """
    out_dim, in_dim = w.shape
    k_pad = _round_up(in_dim, 128)
    n_pad = _round_up(out_dim, 128)

    w_t = jnp.asarray(w).T  # (in_dim, out_dim)
    if compute_dtype is not None:
        w_t = w_t.astype(compute_dtype)
    if w_t.shape != (k_pad, n_pad):
        w_t = jnp.pad(w_t, ((0, k_pad - in_dim), (0, n_pad - out_dim)))

    def pad_vec(v):
        v = jnp.asarray(v, jnp.float32)
        if v.shape[0] != n_pad:
            v = jnp.pad(v, (0, n_pad - out_dim))
        return v.reshape(1, n_pad)

    return dict(w=w_t, b=pad_vec(b), gamma=pad_vec(gamma), beta=pad_vec(beta),
                in_dim=in_dim, out_dim=out_dim, k_pad=k_pad, n_pad=n_pad,
                compute_dtype=compute_dtype)


def fc_layer(x, params, *, eps=1e-5, neg_slope=0.2):
    """x: (..., in_dim) -> (..., out_dim). params from prepare_fc_params."""
    in_dim, out_dim = params["in_dim"], params["out_dim"]
    k_pad, n_pad = params["k_pad"], params["n_pad"]
    w_p, b_p, g_p, be_p = params["w"], params["b"], params["gamma"], params["beta"]
    compute_dtype = params["compute_dtype"]

    lead = x.shape[:-1]
    rows = 1
    for d in lead:
        rows *= d
    out_dtype = x.dtype

    x2 = x.reshape(rows, in_dim)
    if compute_dtype is not None:
        x2 = x2.astype(compute_dtype)

    budget = _vmem_budget_bytes()
    x_it = jnp.dtype(x2.dtype).itemsize
    w_it = jnp.dtype(w_p.dtype).itemsize
    o_it = jnp.dtype(out_dtype).itemsize
    sub = _sublane_multiple(x2.dtype)
    rows_aligned = _round_up(max(rows, 1), sub)
    params_bytes = 8 * n_pad * 4

    def row_tile(cap):
        tm = _round_up(min(cap, rows_aligned), sub)
        # Guarantee >= 2 row tiles when rows allow it so the "parallel" row axis
        # can shard across the two TensorCores of a v7x megacore.
        if rows_aligned >= 2 * sub and _round_up(rows_aligned, tm) // tm < 2:
            tm = _round_up((rows_aligned + 1) // 2, sub)
        return tm

    # ---- Path A: W resident in VMEM (single K step). ----
    tm, resident = None, False
    for cap in (512, 256, 128, 64, 32, 16, 8):
        t = row_tile(cap)
        footprint = (2 * t * k_pad * x_it          # x tiles (double-buffered)
                     + 2 * k_pad * n_pad * w_it    # resident W (counted x2: safe)
                     + 2 * t * n_pad * o_it        # output tiles
                     + t * n_pad * 4               # f32 epilogue temporaries
                     + params_bytes)
        if footprint <= budget:
            tm, resident = t, True
            break

    tk = k_pad
    if not resident:
        # ---- Path B: K-tiled. Prefer big tm (flops per streamed W byte scale
        # with tm), shrink tk to fit the VMEM budget. ----
        tk_candidates = [t for t in (512, 256, 128) if t <= k_pad and k_pad % t == 0]
        found = False
        for cap in (512, 256, 128, 64, 32, 16, 8):
            t = row_tile(cap)
            for tkc in tk_candidates:
                footprint = (2 * t * tkc * x_it
                             + 2 * tkc * n_pad * w_it
                             + 2 * t * n_pad * o_it
                             + t * n_pad * 4        # f32 accumulator scratch
                             + params_bytes)
                if footprint <= budget:
                    tm, tk, found = t, tkc, True
                    break
            if found:
                break
        if not found:  # last resort: minimal legal tiles
            tm, tk = row_tile(8), 128

    rows_pad = _round_up(rows, tm)
    if x2.shape != (rows_pad, k_pad):
        x2 = jnp.pad(x2, ((0, rows_pad - rows), (0, k_pad - in_dim)))

    if resident:
        kernel = functools.partial(_fc_kernel_resident, out_dim=out_dim,
                                   n_pad=n_pad, eps=eps, neg_slope=neg_slope)
        grid = (rows_pad // tm,)
        in_specs = [
            pl.BlockSpec((tm, k_pad), lambda i: (i, 0)),
            pl.BlockSpec((k_pad, n_pad), lambda i: (0, 0)),   # constant -> one DMA
            pl.BlockSpec((1, n_pad), lambda i: (0, 0)),
            pl.BlockSpec((1, n_pad), lambda i: (0, 0)),
            pl.BlockSpec((1, n_pad), lambda i: (0, 0)),
        ]
        out_specs = pl.BlockSpec((tm, n_pad), lambda i: (i, 0))
        scratch_shapes = []
        dim_sem = ("parallel",)
        w_passes = 1
    else:
        kernel = functools.partial(_fc_kernel_ktiled, out_dim=out_dim,
                                   n_pad=n_pad, eps=eps, neg_slope=neg_slope)
        grid = (rows_pad // tm, k_pad // tk)
        in_specs = [
            pl.BlockSpec((tm, tk), lambda i, k: (i, k)),
            pl.BlockSpec((tk, n_pad), lambda i, k: (k, 0)),
            pl.BlockSpec((1, n_pad), lambda i, k: (0, 0)),
            pl.BlockSpec((1, n_pad), lambda i, k: (0, 0)),
            pl.BlockSpec((1, n_pad), lambda i, k: (0, 0)),
        ]
        out_specs = pl.BlockSpec((tm, n_pad), lambda i, k: (i, 0))
        scratch_shapes = [pltpu.VMEM((tm, n_pad), jnp.float32)]
        dim_sem = ("parallel", "arbitrary")
        w_passes = rows_pad // tm  # W is re-streamed once per row tile

    cost = pl.CostEstimate(
        flops=2 * rows_pad * k_pad * n_pad,
        transcendentals=rows_pad,  # one rsqrt per row
        bytes_accessed=(rows_pad * k_pad * x_it
                        + w_passes * k_pad * n_pad * w_it
                        + 3 * n_pad * 4
                        + rows_pad * n_pad * o_it),
    )

    out = pl.pallas_call(
        kernel,
        out_shape=jax.ShapeDtypeStruct((rows_pad, n_pad), out_dtype),
        grid_spec=pltpu.PrefetchScalarGridSpec(
            num_scalar_prefetch=0,
            grid=grid,
            in_specs=in_specs,
            out_specs=out_specs,
            scratch_shapes=scratch_shapes,
        ),
        compiler_params=pltpu.CompilerParams(
            dimension_semantics=dim_sem,
            vmem_limit_bytes=int(budget),
        ),
        cost_estimate=cost,
    )(x2, w_p, b_p, g_p, be_p)

    return out[:rows, :out_dim].reshape(*lead, out_dim)


if __name__ == "__main__":
    in_dim, out_dim = 32, 32
    batch, seq = 2, 4  # leading dims -> rows = 8

    key = jax.random.PRNGKey(0)
    k_x, k_w, k_b = jax.random.split(key, 3)

    # Deterministic params matching nn.Linear(in_dim, out_dim) + LayerNorm(out_dim) init.
    bound = 1.0 / jnp.sqrt(jnp.float32(in_dim))
    w = jax.random.uniform(k_w, (out_dim, in_dim), jnp.float32, -bound, bound)  # torch layout
    b = jax.random.uniform(k_b, (out_dim,), jnp.float32, -bound, bound)
    gamma = jnp.ones((out_dim,), jnp.float32)
    beta = jnp.zeros((out_dim,), jnp.float32)

    x = jax.random.normal(k_x, (batch, seq, in_dim), jnp.float32)

    params = prepare_fc_params(w, b, gamma, beta)   # hoisted: pad/transpose once
    out = fc_layer(x, params)
    out = jax.block_until_ready(out)

    # Pure-JAX reference.
    y_ref = x @ w.T + b
    mu = y_ref.mean(-1, keepdims=True)
    var = ((y_ref - mu) ** 2).mean(-1, keepdims=True)
    y_ref = (y_ref - mu) / jnp.sqrt(var + 1e-5) * gamma + beta
    y_ref = jnp.where(y_ref >= 0, y_ref, 0.2 * y_ref)

    assert out.shape == (batch, seq, out_dim)
    assert jnp.allclose(out, y_ref, atol=1e-4, rtol=1e-4), \
        f"max abs err {jnp.max(jnp.abs(out - y_ref))}"

    print("KERNEL_OK")
</pallas_src>

<mosaic_0001>
module attributes {stable_mosaic.version = 11 : i64} {
  func.func @_fc_kernel_resident(%arg0: i32, %arg1: memref<8x128xf32, #tpu.memory_space<vmem>>, %arg2: memref<128x128xf32, #tpu.memory_space<vmem>>, %arg3: memref<1x128xf32, #tpu.memory_space<vmem>>, %arg4: memref<1x128xf32, #tpu.memory_space<vmem>>, %arg5: memref<1x128xf32, #tpu.memory_space<vmem>>, %arg6: memref<8x128xf32, #tpu.memory_space<vmem>>) attributes {dimension_semantics = [#tpu.dimension_semantics<parallel>], iteration_bounds = array<i64: 1>, scalar_prefetch = 0 : i64, scratch_operands = 0 : i64, tpu.core_type = #tpu.core_type<tc>, window_params = [{transform_indices = @transform_0, window_bounds = array<i64: 8, 128>}, {pipeline_mode = #tpu.pipeline_mode<synchronous>, transform_indices = @transform_1, window_bounds = array<i64: 128, 128>}, {pipeline_mode = #tpu.pipeline_mode<synchronous>, transform_indices = @transform_2, window_bounds = array<i64: 1, 128>}, {pipeline_mode = #tpu.pipeline_mode<synchronous>, transform_indices = @transform_3, window_bounds = array<i64: 1, 128>}, {pipeline_mode = #tpu.pipeline_mode<synchronous>, transform_indices = @transform_4, window_bounds = array<i64: 1, 128>}, {transform_indices = @transform_5, window_bounds = array<i64: 8, 128>}]} {
    %c0 = arith.constant 0 : index
    %c0_0 = arith.constant 0 : index
    %0 = vector.load %arg1[%c0, %c0_0] : memref<8x128xf32, #tpu.memory_space<vmem>>, vector<8x128xf32>
    %c0_1 = arith.constant 0 : index
    %c0_2 = arith.constant 0 : index
    %1 = vector.load %arg2[%c0_1, %c0_2] : memref<128x128xf32, #tpu.memory_space<vmem>>, vector<128x128xf32>
    %cst = arith.constant dense<0.000000e+00> : vector<8x128xf32>
    %2 = tpu.matmul %0, %1, %cst {dimension_numbers = #tpu.dot_dimension_numbers<[1], [0], [0], [1], [0, 0, 1, 1], [], []>} : vector<8x128xf32>, vector<128x128xf32>, vector<8x128xf32> -> vector<8x128xf32>
    %c0_3 = arith.constant 0 : index
    %c0_4 = arith.constant 0 : index
    %3 = vector.load %arg3[%c0_3, %c0_4] : memref<1x128xf32, #tpu.memory_space<vmem>>, vector<1x128xf32>
    %4 = vector.broadcast %3 : vector<1x128xf32> to vector<8x128xf32>
    %5 = arith.addf %2, %4 : vector<8x128xf32>
    %c0_5 = arith.constant 0 : index
    %c0_6 = arith.constant 0 : index
    %6 = vector.load %arg4[%c0_5, %c0_6] : memref<1x128xf32, #tpu.memory_space<vmem>>, vector<1x128xf32>
    %c0_7 = arith.constant 0 : index
    %c0_8 = arith.constant 0 : index
    %7 = vector.load %arg5[%c0_7, %c0_8] : memref<1x128xf32, #tpu.memory_space<vmem>>, vector<1x128xf32>
    %cst_9 = arith.constant dense<0.000000e+00> : vector<8xf32>
    %8 = vector.multi_reduction <add>, %5, %cst_9 [1] : vector<8x128xf32> to vector<8xf32>
    %9 = vector.shape_cast %8 : vector<8xf32> to vector<8x1xf32>
    %cst_10 = arith.constant 3.125000e-02 : f32
    %10 = vector.broadcast %cst_10 : f32 to vector<8x1xf32>
    %11 = arith.mulf %9, %10 : vector<8x1xf32>
    %12 = vector.broadcast %11 : vector<8x1xf32> to vector<8x128xf32>
    %13 = arith.subf %5, %12 : vector<8x128xf32>
    %14 = tpu.iota {dimensions = array<i32: 1>} : vector<8x128xi32>
    %c32_i32 = arith.constant 32 : i32
    %15 = vector.broadcast %c32_i32 : i32 to vector<8x128xi32>
    %16 = arith.cmpi slt, %14, %15 : vector<8x128xi32>
    %cst_11 = arith.constant 0.000000e+00 : f32
    %17 = vector.broadcast %cst_11 : f32 to vector<8x128xf32>
    %18 = arith.select %16, %13, %17 : vector<8x128xi1>, vector<8x128xf32>
    %19 = arith.mulf %18, %18 : vector<8x128xf32>
    %cst_12 = arith.constant dense<0.000000e+00> : vector<8xf32>
    %20 = vector.multi_reduction <add>, %19, %cst_12 [1] : vector<8x128xf32> to vector<8xf32>
    %21 = vector.shape_cast %20 : vector<8xf32> to vector<8x1xf32>
    %cst_13 = arith.constant 3.125000e-02 : f32
    %22 = vector.broadcast %cst_13 : f32 to vector<8x1xf32>
    %23 = arith.mulf %21, %22 : vector<8x1xf32>
    %cst_14 = arith.constant 9.99999974E-6 : f32
    %24 = vector.broadcast %cst_14 : f32 to vector<8x1xf32>
    %25 = arith.addf %23, %24 : vector<8x1xf32>
    %26 = math.rsqrt %25 : vector<8x1xf32>
    %27 = vector.broadcast %26 : vector<8x1xf32> to vector<8x128xf32>
    %28 = arith.mulf %18, %27 : vector<8x128xf32>
    %29 = vector.broadcast %6 : vector<1x128xf32> to vector<8x128xf32>
    %30 = arith.mulf %28, %29 : vector<8x128xf32>
    %31 = vector.broadcast %7 : vector<1x128xf32> to vector<8x128xf32>
    %32 = arith.addf %30, %31 : vector<8x128xf32>
    %cst_15 = arith.constant 0.000000e+00 : f32
    %33 = vector.broadcast %cst_15 : f32 to vector<8x128xf32>
    %34 = arith.cmpf oge, %32, %33 : vector<8x128xf32>
    %cst_16 = arith.constant 2.000000e-01 : f32
    %35 = vector.broadcast %cst_16 : f32 to vector<8x128xf32>
    %36 = arith.mulf %35, %32 : vector<8x128xf32>
    %37 = arith.select %34, %32, %36 : vector<8x128xi1>, vector<8x128xf32>
    %c0_17 = arith.constant 0 : index
    %c0_18 = arith.constant 0 : index
    %38 = vector.load %arg6[%c0_17, %c0_18] : memref<8x128xf32, #tpu.memory_space<vmem>>, vector<8x128xf32>
    tpu.vector_store %arg6[%c0_17, %c0_18], %37 {strides = array<i32>} : memref<8x128xf32, #tpu.memory_space<vmem>>, vector<8x128xf32>,
    return
  }
  func.func @transform_0(%arg0: i32) -> (i32, i32) {
    %c0_i32 = arith.constant 0 : i32
    %c0_i32_0 = arith.constant 0 : i32
    return %arg0, %c0_i32 : i32, i32
  }
  func.func @transform_1(%arg0: i32) -> (i32, i32) {
    %c0_i32 = arith.constant 0 : i32
    %c0_i32_0 = arith.constant 0 : i32
    %c0_i32_1 = arith.constant 0 : i32
    return %c0_i32, %c0_i32_0 : i32, i32
  }
  func.func @transform_2(%arg0: i32) -> (i32, i32) {
    %c0_i32 = arith.constant 0 : i32
    %c0_i32_0 = arith.constant 0 : i32
    %c0_i32_1 = arith.constant 0 : i32
    return %c0_i32, %c0_i32_0 : i32, i32
  }
  func.func @transform_3(%arg0: i32) -> (i32, i32) {
    %c0_i32 = arith.constant 0 : i32
    %c0_i32_0 = arith.constant 0 : i32
    %c0_i32_1 = arith.constant 0 : i32
    return %c0_i32, %c0_i32_0 : i32, i32
  }
  func.func @transform_4(%arg0: i32) -> (i32, i32) {
    %c0_i32 = arith.constant 0 : i32
    %c0_i32_0 = arith.constant 0 : i32
    %c0_i32_1 = arith.constant 0 : i32
    return %c0_i32, %c0_i32_0 : i32, i32
  }
  func.func @transform_5(%arg0: i32) -> (i32, i32) {
    %c0_i32 = arith.constant 0 : i32
    %c0_i32_0 = arith.constant 0 : i32
    return %arg0, %c0_i32 : i32, i32
  }
}

</mosaic_0001>

<bundles_post_ra>
// kernel: tpu_custom_call.1
= control target key start
LH: loop header
LB: loop body
LE: loop exit
PB: predicated region body
PF: predicated region fallthrough
CT: control target
= control target key end

     0   :  { %10 = vsyncpa [#allocation3], 0  ;;  %s289_s0 = inlined_call_operand.hbm [shape: f32[8,128], index: 0, kind: input, shape index: {}]   ;;  %s290_s1 = inlined_call_operand.hbm [shape: f32[128,128], index: 1, kind: input, shape index: {}]   ;;  %s291_s2 = inlined_call_operand.vmem [shape: f32[1,128], index: 2, kind: input, shape index: {}]   ;;  %s292_s3 = inlined_call_operand.vmem [shape: f32[1,128], index: 3, kind: input, shape index: {}]   ;;  %s293_s4 = inlined_call_operand.vmem [shape: f32[1,128], index: 4, kind: input, shape index: {}]   ;;  %s294_s5 = inlined_call_operand.hbm [shape: f32[8,128], index: 5, kind: output, shape index: {}]  }
   0x1   :  { %11 = vsyncpa [#allocation6], 0 }
   0x2   :  { %12 = vsyncpa [#allocation4], 0  ;;  %s18_s20 = sshll.u32 %s289_s0, 4  ;;  %s236_s21 = smov [#allocation2]   ;;  %s19_s20 = int_to_ptr.hbm [resolvable:$true] %s18_s20 }
   0x3   :  { %s20_s22 = sshll.u32 %s236_s21, 4  ;;  %s28_s25 = sshll.u32 %s290_s1, 4  ;;  %s21_s22 = int_to_ptr.vmem [resolvable:$true] %s20_s22  ;;  %s29_s25 = int_to_ptr.hbm [resolvable:$true] %s28_s25 }
   0x4   :  { %23 = dma.hbm_to_vmem [thread:$0]  %s19_s20, 128, %s21_s22, [#allocation3]  }
   0x5   :  { %s237_s26 = smov [#allocation5]   ;;  %s238_s28 = smov 128  }
   0x6   :  { %s30_s27 = sshll.u32 %s237_s26, 4  ;;  %s239_s29 = smov 8   ;;  %s31_s27 = int_to_ptr.vmem [resolvable:$true] %s30_s27 }
   0x7   :  { %36 = dma.hbm_to_vmem [thread:$0]  %s29_s25, 2048, %s31_s27, [#allocation6], %s238_s28, %s238_s28, %s239_s29  }
   0x8   :  { %230 = dma.done.wait [#allocation3], 128  }
   0x9   :  { %231 = vsyncadd [#allocation3], 4294967168 }
   0xa   :  { %232 = dma.done.wait [#allocation6], 2048  }
   0xb   :  { %233 = vsyncadd [#allocation6], 4294965248  ;;  %v67_v0 = vld [vmem:[#allocation5 + $0x78] sm:$0xff]  ;;  %v66_v1 = vld [vmem:[#allocation5 + $0x70] sm:$0xff]  ;;  %v98_v20 = vlaneseq  ;;  %s240_s8 = smov [#allocation7]   ;;  %s137_s12 = sshll.u32 %s294_s5, 4  ;;  %s138_s12 = int_to_ptr.hbm [resolvable:$true] %s137_s12 }
   0xc   :  { %72 = vmatpush.msra.mxu0 %v67_v0  ;;  %v65_v2 = vld [vmem:[#allocation5 + $0x68] sm:$0xff]  ;;  %v64_v3 = vld [vmem:[#allocation5 + $0x60] sm:$0xff]  ;;  %v63_v4 = vld [vmem:[#allocation5 + $0x58] sm:$0xff]  ;;  %s135_s9 = sshll.u32 %s240_s8, 4  ;;  %s136_s9 = int_to_ptr.vmem [resolvable:$true] %s135_s9 }
   0xd   :  { %v62_v5 = vld [vmem:[#allocation5 + $0x50] sm:$0xff]  ;;  %v61_v6 = vld [vmem:[#allocation5 + $0x48] sm:$0xff]  ;;  %v60_v7 = vld [vmem:[#allocation5 + $0x40] sm:$0xff]  ;;  %v99_v21 = vand.u32 127, %v98_v20 }
   0xe   :  { %73 = vmatpush.msra.mxu0 %v66_v1  ;;  %v59_v8 = vld [vmem:[#allocation5 + $0x38] sm:$0xff]  ;;  %v58_v9 = vld [vmem:[#allocation5 + $0x30] sm:$0xff]  ;;  %v57_v10 = vld [vmem:[#allocation5 + $0x28] sm:$0xff] }
   0xf   :  { %v56_v11 = vld [vmem:[#allocation5 + $0x20] sm:$0xff]  ;;  %v55_v12 = vld [vmem:[#allocation5 + $0x18] sm:$0xff]  ;;  %v54_v13 = vld [vmem:[#allocation5 + $0x10] sm:$0xff]  ;;  %vm100_vm0 = vcmp.lt.s32.totalorder %v99_v21, 32 }
  0x10   :  { %74 = vmatpush.msra.mxu0 %v65_v2  ;;  %v53_v14 = vld [vmem:[#allocation5 + $0x8] sm:$0xff]  ;;  %v52_v15 = vld [vmem:[#allocation5] sm:$0xff]  ;;  %v51_v16 = vld [vmem:[#allocation2] sm:$0xff] }
  0x11   :  { %v153_v17 = vld [vmem:[%s291_s2] ss:$0 sm:$0xff] }
  0x12   :  { %75 = vmatpush.msra.mxu0 %v64_v3  ;;  %v154_v36 = vld [vmem:[%s292_s3] ss:$0 sm:$0xff] }
  0x13   :  { %v155_v39 = vld [vmem:[%s293_s4] ss:$0 sm:$0xff] }
  0x14   :  { %76 = vmatpush.msra.mxu0 %v63_v4 }
  0x16   :  { %77 = vmatpush.msra.mxu0 %v62_v5 }
  0x18   :  { %78 = vmatpush.msra.mxu0 %v61_v6 }
  0x1a   :  { %79 = vmatpush.msra.mxu0 %v60_v7 }
  0x1c   :  { %80 = vmatpush.msra.mxu0 %v59_v8 }
  0x1e   :  { %81 = vmatpush.msra.mxu0 %v58_v9 }
  0x20   :  { %82 = vmatpush.msra.mxu0 %v57_v10 }
  0x22   :  { %83 = vmatpush.msra.mxu0 %v56_v11 }
  0x24   :  { %84 = vmatpush.msra.mxu0 %v55_v12 }
  0x26   :  { %85 = vmatpush.msra.mxu0 %v54_v13 }
  0x28   :  { %86 = vmatpush.msra.mxu0 %v53_v14 }
  0x2a   :  { %87 = vmatpush.msra.mxu0 %v52_v15 }
  0x2b   :  { %88 = vmatmul.f32.vlgmr.msra.gmra.mxu0 %v51_v16 }
  0xa8   :  { %v89_v18 = vpop.f32.mrf.mxu0 }
  0xa9   :  { %v90_v19 = vadd.f32 %v153_v17, %v89_v18 }
  0xab   :  { %94 = vadd.xlane.f32.xlu0 %v90_v19 }
 0x11e   :  { %v95_v22 = vpop.xlane.xlu0 %94 }
 0x11f   :  { %v96_v23 = vmul.f32 0.03125, %v95_v22 }
 0x121   :  { %v97_v24 = vsub.f32 %v90_v19, %v96_v23 }
 0x123   :  { %v101_v25 = vsel %vm100_vm0, %v97_v24, 0.0 }
 0x124   :  { %v102_v26 = vmul.f32 %v101_v25, %v101_v25 }
 0x126   :  { %103 = vadd.xlane.f32.xlu0 %v102_v26 }
 0x199   :  { %v104_v27 = vpop.xlane.xlu0 %103 }
 0x19a   :  { %v105_v28 = vmul.f32 0.03125, %v104_v27 }
 0x19c   :  { %v106_v29 = vadd.f32 1e-05, %v105_v28 }
 0x19e   :  { %156 = vrsqrt.f32 %v106_v29  ;;  %vm113_vm2 = vweird.f32 %v106_v29 }
 0x1a4   :  { %v157_v30 = vpop.eup %156 }
 0x1a5   :  { %v108_v31 = vmul.f32 %v157_v30, %v106_v29  ;;  %vm114_vm1 = vweird.f32 %v157_v30 }
 0x1a6   :  { %vm115_vm3 = vmor %vm113_vm2, %vm114_vm1 }
 0x1a7   :  { %v109_v32 = vmul.f32 %v157_v30, %v108_v31 }
 0x1a9   :  { %v110_v33 = vmul.f32 0.5, %v109_v32 }
 0x1ab   :  { %v111_v34 = vsub.f32 1.5, %v110_v33 }
 0x1ad   :  { %v112_v35 = vmul.f32 %v157_v30, %v111_v34 }
 0x1af   :  { %v116_v37 = vsel %vm115_vm3, %v157_v30, %v112_v35 }
 0x1b0   :  { %v117_v38 = vmul.f32 %v116_v37, %v101_v25 }
 0x1b2   :  { %v121_v40 = vmul.f32 %v154_v36, %v117_v38 }
 0x1b4   :  { %v125_v41 = vadd.f32 %v155_v39, %v121_v40 }
 0x1b6   :  { %vm126_vm4 = vcmp.ge.f32.partialorder %v125_v41, 0.0  ;;  %v127_v42 = vmul.f32 0.2, %v125_v41 }
 0x1b8   :  { %v128_v43 = vsel %vm126_vm4, %v125_v41, %v127_v42 }
 0x1b9   :  { %129 = vst [vmem:[#allocation7] sm:$0xff] %v128_v43 }
 0x1ba   :  { %140 = dma.vmem_to_hbm [thread:$0]  %s136_s9, 128, %s138_s12, [#allocation4]  }
 0x1bb   :  { %234 = dma.done.wait [#allocation4], 128  }
 0x1bc   :  { %235 = vsyncadd [#allocation4], 4294967168 }
 0x1bd   :  { %145 = vsyncpa [#allocation3], 1 }
 0x1be   :  { %146 = vsyncpa [#allocation6], 1 }
 0x1bf   :  { %147 = vsyncpa [#allocation4], 1 }

</bundles_post_ra>
